<compile_context>
chip_gen: v5e
topology: v5e:2x2
jax: 0.10.0
libtpu: 0.0.40
codegen_flags: <defaults>
</compile_context>

<pallas_src>
import functools

import jax
import jax.numpy as jnp
from jax import lax
from jax.experimental import pallas as pl
from jax.experimental.pallas import tpu as pltpu

LRELU_SLOPE = 0.01
BN_EPS = 1e-5
LN_EPS = 1e-5
DOT_DT = jnp.bfloat16  # MXU operand dtype (epilogues stay f32)


def _rup(x, m):
    return ((x + m - 1) // m) * m


# ----------------------------- in-kernel helpers -----------------------------

def _ln(x, g, b):
    mu = jnp.mean(x, axis=-1, keepdims=True)
    xc = x - mu
    var = jnp.mean(xc * xc, axis=-1, keepdims=True)
    return xc * lax.rsqrt(var + LN_EPS) * g + b


def _leaky_relu(x):
    return jnp.where(x >= 0, x, LRELU_SLOPE * x)


def _swish(x):
    return x * jax.nn.sigmoid(x)


# ----------------------------- Gabor conv stack (one fused kernel) -----------------------------

def _gabor_kernel(x0_ref, w0, b0, s0, t0, w1, b1, s1, t1, w2, b2, s2, t2, o_ref, *, L):
    # layer 0: Conv1d(1->32, k=7, pad=3) as one im2col matmul (L,8)@(8,32), + BN + lrelu
    y = jnp.dot(x0_ref[...].astype(DOT_DT), w0[...], preferred_element_type=jnp.float32)
    y = _leaky_relu((y + b0[...]) * s0[...] + t0[...])                 # (L, 32)

    # layer 1: Conv1d(32->64, k=5, pad=2) as one im2col matmul (L,160)@(160,64)
    rows1 = _rup(L + 4, 8)
    y1p = jnp.concatenate([jnp.zeros((2, 32), jnp.float32), y,
                           jnp.zeros((rows1 - 2 - L, 32), jnp.float32)], axis=0)
    cols1 = jnp.concatenate([y1p[k:k + L, :] for k in range(5)], axis=-1)
    y = jnp.dot(cols1.astype(DOT_DT), w1[...], preferred_element_type=jnp.float32)
    y = _leaky_relu((y + b1[...]) * s1[...] + t1[...])                 # (L, 64)

    # layer 2: Conv1d(64->128, k=3, pad=1) as one im2col matmul (L,192)@(192,128)
    rows2 = _rup(L + 2, 8)
    y2p = jnp.concatenate([jnp.zeros((1, 64), jnp.float32), y,
                           jnp.zeros((rows2 - 1 - L, 64), jnp.float32)], axis=0)
    cols2 = jnp.concatenate([y2p[k:k + L, :] for k in range(3)], axis=-1)
    y = jnp.dot(cols2.astype(DOT_DT), w2[...], preferred_element_type=jnp.float32)
    o_ref[...] = _leaky_relu((y + b2[...]) * s2[...] + t2[...])        # (L, 128) lane-dense


def gabor_forward(x_bl, g):
    """x_bl: (B, L) signal (Cin = 1).  Returns (B, L, 128).  MaxPool1d(k=1) is identity."""
    B, L = x_bl.shape
    xpad = jnp.pad(x_bl, ((0, 0), (3, 3)))
    idx = jnp.arange(L)[:, None] + jnp.arange(7)[None, :]
    x0 = xpad[:, idx]                                                  # (B, L, 7) im2col
    x0 = jnp.pad(x0, ((0, 0), (0, 0), (0, 1)))                         # pad taps to 8

    def vec(c):
        return pl.BlockSpec((1, c), lambda i: (0, 0))

    kernel = functools.partial(_gabor_kernel, L=L)
    return pl.pallas_call(
        kernel,
        grid=(B,),
        out_shape=jax.ShapeDtypeStruct((B, L, 128), jnp.float32),
        in_specs=[
            pl.BlockSpec((None, L, 8), lambda i: (i, 0, 0)),
            pl.BlockSpec((8, 32), lambda i: (0, 0)), vec(32), vec(32), vec(32),
            pl.BlockSpec((160, 64), lambda i: (0, 0)), vec(64), vec(64), vec(64),
            pl.BlockSpec((192, 128), lambda i: (0, 0)), vec(128), vec(128), vec(128),
        ],
        out_specs=pl.BlockSpec((None, L, 128), lambda i: (i, 0, 0)),
        compiler_params=pltpu.CompilerParams(dimension_semantics=("parallel",)),
    )(x0, g["w0"], g["b0"], g["s0"], g["t0"],
      g["w1"], g["b1"], g["s1"], g["t1"],
      g["w2"], g["b2"], g["s2"], g["t2"])


# ----------------------------- fused Conformer block (one kernel per batch element) -----------------------------

def _conformer_kernel(x_ref,
                      f1g, f1b, f1w1, f1b1, f1w2, f1b2,
                      ag, ab, wqkv, rel, wo, bo,
                      cg, cb, pw1w, pw1b, dww, dwb, bns, bnt, pw2w, pw2b,
                      f2g, f2b, f2w1, f2b1, f2w2, f2b2,
                      pg, pb,
                      o_ref, *, heads, dim_head, K, inner_c, scale):
    N = x_ref.shape[0]
    x = x_ref[...]                                                     # (N, dim) f32

    # ---------- FF1 (pre-LN, Swish, 0.5-scaled residual) ----------
    h = _ln(x, f1g[...], f1b[...])
    h = jnp.dot(h.astype(DOT_DT), f1w1[...], preferred_element_type=jnp.float32) + f1b1[...]
    h = _swish(h)
    h = jnp.dot(h.astype(DOT_DT), f1w2[...], preferred_element_type=jnp.float32) + f1b2[...]
    x = x + 0.5 * h

    # ---------- MHSA (pre-LN, stacked-head QKV, Shaw rel-pos, residual) ----------
    hn = _ln(x, ag[...], ab[...]).astype(DOT_DT)
    qkv = jnp.dot(hn, wqkv[...], preferred_element_type=jnp.float32)   # (N, 3*H*Dh)
    relT = rel[...]                                                    # (Wp, Dh) bf16
    HD = heads * dim_head
    row = lax.broadcasted_iota(jnp.int32, (N, 1), 0)
    lshift = (N - 1) - row                                             # per-row skew amount
    outs = []
    for hd in range(heads):
        q = qkv[:, hd * dim_head:(hd + 1) * dim_head]
        k = qkv[:, HD + hd * dim_head:HD + (hd + 1) * dim_head]
        v = qkv[:, 2 * HD + hd * dim_head:2 * HD + (hd + 1) * dim_head]
        dots = lax.dot_general(q.astype(DOT_DT), k.astype(DOT_DT),
                               (((1,), (1,)), ((), ())),
                               preferred_element_type=jnp.float32)     # (N, N)
        # positional scores on the MXU against the (2N-1)-row rel table (lane-padded)
        qr = lax.dot_general(q.astype(DOT_DT), relT,
                             (((1,), (1,)), ((), ())),
                             preferred_element_type=jnp.float32)       # (N, Wp)
        # skew: pos[i, j] = qr[i, j + (N-1-i)], via log2(N) masked lane rolls
        b = 1
        while b < N:
            rolled = jnp.roll(qr, -b, axis=1)
            qr = jnp.where((lshift & b) > 0, rolled, qr)
            b *= 2
        pos = qr[:, :N]
        logits = (dots + pos) * scale
        m = jnp.max(logits, axis=-1, keepdims=True)
        e = jnp.exp(logits - m)
        p = e * pl.reciprocal(jnp.sum(e, axis=-1, keepdims=True), approx=True)
        outs.append(jnp.dot(p.astype(DOT_DT), v.astype(DOT_DT),
                            preferred_element_type=jnp.float32))       # (N, Dh)
    o_cat = jnp.concatenate(outs, axis=-1)                             # (N, H*Dh)
    x = x + jnp.dot(o_cat.astype(DOT_DT), wo[...],
                    preferred_element_type=jnp.float32) + bo[...]

    # ---------- Conv module (pre-LN, pointwise, GLU, depthwise, BN, Swish, pointwise, residual) ----------
    h = _ln(x, cg[...], cb[...])
    y = jnp.dot(h.astype(DOT_DT), pw1w[...], preferred_element_type=jnp.float32) + pw1b[...]
    glu = y[:, :inner_c] * jax.nn.sigmoid(y[:, inner_c:])              # GLU over channels
    pad_l = K // 2
    rows = _rup(N + K - 1, 8)
    gp = jnp.concatenate([jnp.zeros((pad_l, inner_c), jnp.float32), glu,
                          jnp.zeros((rows - pad_l - N, inner_c), jnp.float32)], axis=0)
    dw = dww[...]                                                      # (K, inner_c) f32
    acc = jnp.zeros((N, inner_c), jnp.float32)
    for k in range(K):                                                 # depthwise taps (VPU)
        acc = acc + gp[k:k + N, :] * dw[k:k + 1, :]
    dconv = (acc + dwb[...]) * bns[...] + bnt[...]                     # eval-mode BatchNorm
    dconv = _swish(dconv)
    x = x + jnp.dot(dconv.astype(DOT_DT), pw2w[...],
                    preferred_element_type=jnp.float32) + pw2b[...]

    # ---------- FF2 + post-LayerNorm ----------
    h = _ln(x, f2g[...], f2b[...])
    h = jnp.dot(h.astype(DOT_DT), f2w1[...], preferred_element_type=jnp.float32) + f2b1[...]
    h = _swish(h)
    h = jnp.dot(h.astype(DOT_DT), f2w2[...], preferred_element_type=jnp.float32) + f2b2[...]
    x = x + 0.5 * h
    o_ref[...] = _ln(x, pg[...], pb[...])


def conformer_block_forward(x, bp, *, heads, dim_head):
    B, N, dim = x.shape
    K = bp["dw_w"].shape[0]
    inner_c = bp["dw_b"].shape[1]
    kernel = functools.partial(_conformer_kernel, heads=heads, dim_head=dim_head,
                               K=K, inner_c=inner_c, scale=float(dim_head) ** -0.5)

    def full(a):  # grid-invariant weight: whole array, constant block index
        return pl.BlockSpec(a.shape, lambda i: (0,) * a.ndim)

    args = [bp["ff1_g"], bp["ff1_b"], bp["ff1_w1"], bp["ff1_b1"], bp["ff1_w2"], bp["ff1_b2"],
            bp["attn_g"], bp["attn_b"], bp["wqkv"], bp["rel"], bp["wo"], bp["bo"],
            bp["conv_g"], bp["conv_b"], bp["pw1_w"], bp["pw1_b"], bp["dw_w"], bp["dw_b"],
            bp["bn_s"], bp["bn_t"], bp["pw2_w"], bp["pw2_b"],
            bp["ff2_g"], bp["ff2_b"], bp["ff2_w1"], bp["ff2_b1"], bp["ff2_w2"], bp["ff2_b2"],
            bp["post_g"], bp["post_b"]]
    in_specs = [pl.BlockSpec((None, N, dim), lambda i: (i, 0, 0))] + [full(a) for a in args]
    return pl.pallas_call(
        kernel,
        grid=(B,),
        out_shape=jax.ShapeDtypeStruct((B, N, dim), jnp.float32),
        in_specs=in_specs,
        out_specs=pl.BlockSpec((None, N, dim), lambda i: (i, 0, 0)),
        compiler_params=pltpu.CompilerParams(dimension_semantics=("parallel",)),
    )(x, *args)


# ----------------------------- FC head (fused, parallel over batch) -----------------------------

def _fc_kernel(x_ref, w1, b1, w2, b2, o_ref):
    h = jnp.dot(x_ref[...].astype(DOT_DT), w1[...], preferred_element_type=jnp.float32) + b1[...]
    h = jnp.maximum(h, 0.0)
    o_ref[...] = jnp.dot(h.astype(DOT_DT), w2[...], preferred_element_type=jnp.float32) + b2[...]


def fc_head(x, fp):
    B, N, dim = x.shape
    F = N * dim
    H = fp["fc1_w"].shape[1]
    C = fp["fc2_w"].shape[1]
    flat = x.reshape(B, 1, F)   # torch .view(-1, 128*L) on the (B, L, 128) tensor
    out = pl.pallas_call(
        _fc_kernel,
        grid=(B,),
        out_shape=jax.ShapeDtypeStruct((B, 1, C), jnp.float32),
        in_specs=[
            pl.BlockSpec((None, 1, F), lambda i: (i, 0, 0)),
            pl.BlockSpec((F, H), lambda i: (0, 0)),
            pl.BlockSpec((1, H), lambda i: (0, 0)),
            pl.BlockSpec((H, C), lambda i: (0, 0)),
            pl.BlockSpec((1, C), lambda i: (0, 0)),
        ],
        out_specs=pl.BlockSpec((None, 1, C), lambda i: (i, 0, 0)),
        compiler_params=pltpu.CompilerParams(dimension_semantics=("parallel",)),
    )(flat, fp["fc1_w"], fp["fc1_b"], fp["fc2_w"], fp["fc2_b"])
    return out.reshape(B, C)


# ----------------------------- one-time parameter preparation -----------------------------

def bn_fold(bn):
    s = bn["g"] / jnp.sqrt(bn["rv"] + BN_EPS)
    t = bn["b"] - bn["rm"] * s
    return s, t


def prepare_params(raw, *, sample_length):
    """Fold BN, reshape conv weights to im2col layout, stack QKV heads, gather the
    relative-position table, and cast every matmul weight to bf16 ONCE."""
    N = sample_length
    heads, dim_head, maxp = raw["heads"], raw["dim_head"], raw["max_pos_emb"]
    HD = heads * dim_head

    def v(a):
        return a.reshape(1, -1).astype(jnp.float32)

    s0, t0 = bn_fold(raw["bn1"])
    s1, t1 = bn_fold(raw["bn2"])
    s2, t2 = bn_fold(raw["bn3"])
    gabor = dict(
        w0=jnp.pad(raw["g0_w"].reshape(7, 32), ((0, 1), (0, 0))).astype(DOT_DT),
        b0=v(raw["g0_b"]), s0=v(s0), t0=v(t0),
        w1=raw["c1_w"].reshape(5 * 32, 64).astype(DOT_DT),
        b1=v(raw["c1_b"]), s1=v(s1), t1=v(t1),
        w2=raw["c2_w"].reshape(3 * 64, 128).astype(DOT_DT),
        b2=v(raw["c2_b"]), s2=v(s2), t2=v(t2),
    )

    # Only the 2N-1 distances that occur; ordered so pos[i,j] = (q @ rel.T)[i, j+(N-1-i)].
    m = jnp.arange(2 * N - 1)
    d = jnp.clip((N - 1) - m, -maxp, maxp) + maxp
    Wp = max(_rup(2 * N - 1, 128), 128)

    blocks = []
    for blk in raw["blocks"]:
        a, c = blk["attn"], blk["conv"]
        f1, f2 = blk["ff1"], blk["ff2"]
        dim = a["wq"].shape[1]
        wq = jnp.transpose(a["wq"], (1, 0, 2)).reshape(dim, HD)
        wk = jnp.transpose(a["wk"], (1, 0, 2)).reshape(dim, HD)
        wv = jnp.transpose(a["wv"], (1, 0, 2)).reshape(dim, HD)
        rel = a["rel_emb"][d]
        rel = jnp.pad(rel, ((0, Wp - rel.shape[0]), (0, 0)))
        bs, bt = bn_fold(c["bn"])
        blocks.append(dict(
            ff1_g=v(f1["ln_g"]), ff1_b=v(f1["ln_b"]),
            ff1_w1=f1["w1"].astype(DOT_DT), ff1_b1=v(f1["b1"]),
            ff1_w2=f1["w2"].astype(DOT_DT), ff1_b2=v(f1["b2"]),
            attn_g=v(a["ln_g"]), attn_b=v(a["ln_b"]),
            wqkv=jnp.concatenate([wq, wk, wv], axis=1).astype(DOT_DT),
            rel=rel.astype(DOT_DT),
            wo=a["wo"].reshape(HD, dim).astype(DOT_DT), bo=v(a["bo"]),
            conv_g=v(c["ln_g"]), conv_b=v(c["ln_b"]),
            pw1_w=c["pw1_w"].astype(DOT_DT), pw1_b=v(c["pw1_b"]),
            dw_w=c["dw_w"].astype(jnp.float32), dw_b=v(c["dw_b"]),
            bn_s=v(bs), bn_t=v(bt),
            pw2_w=c["pw2_w"].astype(DOT_DT), pw2_b=v(c["pw2_b"]),
            ff2_g=v(f2["ln_g"]), ff2_b=v(f2["ln_b"]),
            ff2_w1=f2["w1"].astype(DOT_DT), ff2_b1=v(f2["b1"]),
            ff2_w2=f2["w2"].astype(DOT_DT), ff2_b2=v(f2["b2"]),
            post_g=v(blk["post_g"]), post_b=v(blk["post_b"]),
        ))

    fc = dict(fc1_w=raw["fc1_w"].astype(DOT_DT), fc1_b=v(raw["fc1_b"]),
              fc2_w=raw["fc2_w"].astype(DOT_DT), fc2_b=v(raw["fc2_b"]))
    return dict(gabor=gabor, blocks=blocks, fc=fc, heads=heads, dim_head=dim_head)


# ----------------------------- model glue -----------------------------

def wo_gabor_forward(x_ncl, prep):
    """x_ncl: (B, 1, L) PyTorch NCL input.  Returns (B, num_classes)."""
    x = x_ncl[:, 0, :]                                  # (B, L), Cin = 1
    x = gabor_forward(x, prep["gabor"])                 # (B, L, 128) == gabor output permuted
    for bp in prep["blocks"]:
        x = conformer_block_forward(x, bp, heads=prep["heads"], dim_head=prep["dim_head"])
    return fc_head(x, prep["fc"])                       # Dropout (eval) = identity


# ----------------------------- parameter init -----------------------------

def init_params(key, *, dim=128, depth=1, dim_head=64, heads=8, ff_mult=4,
                conv_expansion_factor=2, conv_kernel_size=31,
                num_classes=2, sample_length=16, max_pos_emb=512):
    keys = iter(jax.random.split(key, 256))

    def nrm(shape, s=0.05):
        return s * jax.random.normal(next(keys), shape, jnp.float32)

    def init_bn(c):
        return dict(g=jnp.ones((c,), jnp.float32) + nrm((c,), 0.1),
                    b=nrm((c,), 0.1),
                    rm=nrm((c,), 0.1),
                    rv=jnp.ones((c,), jnp.float32) + jnp.abs(nrm((c,), 0.1)))

    def init_ff(d, inner):
        return dict(ln_g=jnp.ones((d,), jnp.float32), ln_b=jnp.zeros((d,), jnp.float32),
                    w1=nrm((d, inner)), b1=nrm((inner,)),
                    w2=nrm((inner, d)), b2=nrm((d,)))

    p = dict(heads=heads, dim_head=dim_head, max_pos_emb=max_pos_emb)

    # GaborNN1D (g0 is a plain learned Conv1d in the reference; weights stored (K, Cin, Cout))
    p["g0_w"], p["g0_b"] = nrm((7, 1, 32)), nrm((32,))
    p["bn1"] = init_bn(32)
    p["c1_w"], p["c1_b"] = nrm((5, 32, 64)), nrm((64,))
    p["bn2"] = init_bn(64)
    p["c2_w"], p["c2_b"] = nrm((3, 64, 128)), nrm((128,))
    p["bn3"] = init_bn(128)

    inner_ff = dim * ff_mult
    inner_conv = dim * conv_expansion_factor
    blocks = []
    for _ in range(depth):
        blocks.append(dict(
            ff1=init_ff(dim, inner_ff),
            attn=dict(ln_g=jnp.ones((dim,), jnp.float32), ln_b=jnp.zeros((dim,), jnp.float32),
                      wq=nrm((heads, dim, dim_head)), wk=nrm((heads, dim, dim_head)),
                      wv=nrm((heads, dim, dim_head)),
                      rel_emb=nrm((2 * max_pos_emb + 1, dim_head), 0.02),
                      wo=nrm((heads, dim_head, dim)), bo=nrm((dim,))),
            conv=dict(ln_g=jnp.ones((dim,), jnp.float32), ln_b=jnp.zeros((dim,), jnp.float32),
                      pw1_w=nrm((dim, 2 * inner_conv)), pw1_b=nrm((2 * inner_conv,)),
                      dw_w=nrm((conv_kernel_size, inner_conv)), dw_b=nrm((inner_conv,)),
                      bn=init_bn(inner_conv),
                      pw2_w=nrm((inner_conv, dim)), pw2_b=nrm((dim,))),
            ff2=init_ff(dim, inner_ff),
            post_g=jnp.ones((dim,), jnp.float32), post_b=jnp.zeros((dim,), jnp.float32)))
    p["blocks"] = blocks

    p["fc1_w"], p["fc1_b"] = nrm((dim * sample_length, 128)), nrm((128,))
    p["fc2_w"], p["fc2_b"] = nrm((128, num_classes)), nrm((num_classes,))
    return p


# ----------------------------- main -----------------------------

if __name__ == "__main__":
    B = 2
    sample_length = 16     # small toy length; GaborNN1D fixes dim to 128
    dim = 128
    depth = 1
    num_classes = 2

    key = jax.random.PRNGKey(0)
    k_x, k_p = jax.random.split(key)
    x = jax.random.normal(k_x, (B, 1, sample_length), jnp.float32)  # PyTorch NCL input
    raw = init_params(k_p, dim=dim, depth=depth, sample_length=sample_length,
                      num_classes=num_classes)
    prep = prepare_params(raw, sample_length=sample_length)

    out = wo_gabor_forward(x, prep)
    out = jax.block_until_ready(out)
    assert out.shape == (B, num_classes), out.shape
    assert bool(jnp.all(jnp.isfinite(out)))
    print("KERNEL_OK")
</pallas_src>

<mosaic_0001>
module attributes {stable_mosaic.version = 11 : i64} {
  func.func @_gabor_kernel(%arg0: i32, %arg1: memref<1x16x8xf32, #tpu.memory_space<vmem>>, %arg2: memref<8x32xbf16, #tpu.memory_space<vmem>>, %arg3: memref<1x32xf32, #tpu.memory_space<vmem>>, %arg4: memref<1x32xf32, #tpu.memory_space<vmem>>, %arg5: memref<1x32xf32, #tpu.memory_space<vmem>>, %arg6: memref<160x64xbf16, #tpu.memory_space<vmem>>, %arg7: memref<1x64xf32, #tpu.memory_space<vmem>>, %arg8: memref<1x64xf32, #tpu.memory_space<vmem>>, %arg9: memref<1x64xf32, #tpu.memory_space<vmem>>, %arg10: memref<192x128xbf16, #tpu.memory_space<vmem>>, %arg11: memref<1x128xf32, #tpu.memory_space<vmem>>, %arg12: memref<1x128xf32, #tpu.memory_space<vmem>>, %arg13: memref<1x128xf32, #tpu.memory_space<vmem>>, %arg14: memref<1x16x128xf32, #tpu.memory_space<vmem>>) attributes {dimension_semantics = [#tpu.dimension_semantics<parallel>], iteration_bounds = array<i64: 2>, scalar_prefetch = 0 : i64, scratch_operands = 0 : i64, tpu.core_type = #tpu.core_type<tc>, window_params = [{transform_indices = @transform_0, window_bounds = array<i64: 1, 16, 8>}, {pipeline_mode = #tpu.pipeline_mode<synchronous>, transform_indices = @transform_1, window_bounds = array<i64: 8, 32>}, {pipeline_mode = #tpu.pipeline_mode<synchronous>, transform_indices = @transform_2, window_bounds = array<i64: 1, 32>}, {pipeline_mode = #tpu.pipeline_mode<synchronous>, transform_indices = @transform_3, window_bounds = array<i64: 1, 32>}, {pipeline_mode = #tpu.pipeline_mode<synchronous>, transform_indices = @transform_4, window_bounds = array<i64: 1, 32>}, {pipeline_mode = #tpu.pipeline_mode<synchronous>, transform_indices = @transform_5, window_bounds = array<i64: 160, 64>}, {pipeline_mode = #tpu.pipeline_mode<synchronous>, transform_indices = @transform_6, window_bounds = array<i64: 1, 64>}, {pipeline_mode = #tpu.pipeline_mode<synchronous>, transform_indices = @transform_7, window_bounds = array<i64: 1, 64>}, {pipeline_mode = #tpu.pipeline_mode<synchronous>, transform_indices = @transform_8, window_bounds = array<i64: 1, 64>}, {pipeline_mode = #tpu.pipeline_mode<synchronous>, transform_indices = @transform_9, window_bounds = array<i64: 192, 128>}, {pipeline_mode = #tpu.pipeline_mode<synchronous>, transform_indices = @transform_10, window_bounds = array<i64: 1, 128>}, {pipeline_mode = #tpu.pipeline_mode<synchronous>, transform_indices = @transform_11, window_bounds = array<i64: 1, 128>}, {pipeline_mode = #tpu.pipeline_mode<synchronous>, transform_indices = @transform_12, window_bounds = array<i64: 1, 128>}, {transform_indices = @transform_13, window_bounds = array<i64: 1, 16, 128>}]} {
    %c0 = arith.constant 0 : index
    %c0_0 = arith.constant 0 : index
    %c0_1 = arith.constant 0 : index
    %0 = vector.load %arg1[%c0, %c0_0, %c0_1] : memref<1x16x8xf32, #tpu.memory_space<vmem>>, vector<1x16x8xf32>
    %1 = vector.shape_cast %0 : vector<1x16x8xf32> to vector<16x8xf32>
    %2 = arith.truncf %1 : vector<16x8xf32> to vector<16x8xbf16>
    %c0_2 = arith.constant 0 : index
    %c0_3 = arith.constant 0 : index
    %3 = vector.load %arg2[%c0_2, %c0_3] : memref<8x32xbf16, #tpu.memory_space<vmem>>, vector<8x32xbf16>
    %cst = arith.constant dense<0.000000e+00> : vector<16x32xf32>
    %4 = tpu.matmul %2, %3, %cst {dimension_numbers = #tpu.dot_dimension_numbers<[1], [0], [0], [1], [0, 0, 1, 1], [], []>} : vector<16x8xbf16>, vector<8x32xbf16>, vector<16x32xf32> -> vector<16x32xf32>
    %c0_4 = arith.constant 0 : index
    %c0_5 = arith.constant 0 : index
    %5 = vector.load %arg3[%c0_4, %c0_5] : memref<1x32xf32, #tpu.memory_space<vmem>>, vector<1x32xf32>
    %6 = vector.broadcast %5 : vector<1x32xf32> to vector<16x32xf32>
    %7 = arith.addf %4, %6 : vector<16x32xf32>
    %c0_6 = arith.constant 0 : index
    %c0_7 = arith.constant 0 : index
    %8 = vector.load %arg4[%c0_6, %c0_7] : memref<1x32xf32, #tpu.memory_space<vmem>>, vector<1x32xf32>
    %9 = vector.broadcast %8 : vector<1x32xf32> to vector<16x32xf32>
    %10 = arith.mulf %7, %9 : vector<16x32xf32>
    %c0_8 = arith.constant 0 : index
    %c0_9 = arith.constant 0 : index
    %11 = vector.load %arg5[%c0_8, %c0_9] : memref<1x32xf32, #tpu.memory_space<vmem>>, vector<1x32xf32>
    %12 = vector.broadcast %11 : vector<1x32xf32> to vector<16x32xf32>
    %13 = arith.addf %10, %12 : vector<16x32xf32>
    %cst_10 = arith.constant 0.000000e+00 : f32
    %14 = vector.broadcast %cst_10 : f32 to vector<16x32xf32>
    %15 = arith.cmpf oge, %13, %14 : vector<16x32xf32>
    %cst_11 = arith.constant 0.00999999977 : f32
    %16 = vector.broadcast %cst_11 : f32 to vector<16x32xf32>
    %17 = arith.mulf %16, %13 : vector<16x32xf32>
    %18 = arith.select %15, %13, %17 : vector<16x32xi1>, vector<16x32xf32>
    %cst_12 = arith.constant 0.000000e+00 : f32
    %19 = vector.broadcast %cst_12 : f32 to vector<2x32xf32>
    %cst_13 = arith.constant 0.000000e+00 : f32
    %20 = vector.broadcast %cst_13 : f32 to vector<6x32xf32>
    %21 = tpu.concatenate %19, %18, %20 in 0 : vector<2x32xf32>, vector<16x32xf32>, vector<6x32xf32> -> vector<24x32xf32>
    %22 = vector.extract_strided_slice %21 {offsets = [0, 0], sizes = [16, 32], strides = [1, 1]} : vector<24x32xf32> to vector<16x32xf32>
    %23 = vector.extract_strided_slice %21 {offsets = [1, 0], sizes = [16, 32], strides = [1, 1]} : vector<24x32xf32> to vector<16x32xf32>
    %24 = vector.extract_strided_slice %21 {offsets = [2, 0], sizes = [16, 32], strides = [1, 1]} : vector<24x32xf32> to vector<16x32xf32>
    %25 = vector.extract_strided_slice %21 {offsets = [3, 0], sizes = [16, 32], strides = [1, 1]} : vector<24x32xf32> to vector<16x32xf32>
    %26 = vector.extract_strided_slice %21 {offsets = [4, 0], sizes = [16, 32], strides = [1, 1]} : vector<24x32xf32> to vector<16x32xf32>
    %27 = tpu.concatenate %22, %23, %24, %25, %26 in 1 : vector<16x32xf32>, vector<16x32xf32>, vector<16x32xf32>, vector<16x32xf32>, vector<16x32xf32> -> vector<16x160xf32>
    %28 = arith.truncf %27 : vector<16x160xf32> to vector<16x160xbf16>
    %c0_14 = arith.constant 0 : index
    %c0_15 = arith.constant 0 : index
    %29 = vector.load %arg6[%c0_14, %c0_15] : memref<160x64xbf16, #tpu.memory_space<vmem>>, vector<160x64xbf16>
    %cst_16 = arith.constant dense<0.000000e+00> : vector<16x64xf32>
    %30 = tpu.matmul %28, %29, %cst_16 {dimension_numbers = #tpu.dot_dimension_numbers<[1], [0], [0], [1], [0, 0, 1, 1], [], []>} : vector<16x160xbf16>, vector<160x64xbf16>, vector<16x64xf32> -> vector<16x64xf32>
    %c0_17 = arith.constant 0 : index
    %c0_18 = arith.constant 0 : index
    %31 = vector.load %arg7[%c0_17, %c0_18] : memref<1x64xf32, #tpu.memory_space<vmem>>, vector<1x64xf32>
    %32 = vector.broadcast %31 : vector<1x64xf32> to vector<16x64xf32>
    %33 = arith.addf %30, %32 : vector<16x64xf32>
    %c0_19 = arith.constant 0 : index
    %c0_20 = arith.constant 0 : index
    %34 = vector.load %arg8[%c0_19, %c0_20] : memref<1x64xf32, #tpu.memory_space<vmem>>, vector<1x64xf32>
    %35 = vector.broadcast %34 : vector<1x64xf32> to vector<16x64xf32>
    %36 = arith.mulf %33, %35 : vector<16x64xf32>
    %c0_21 = arith.constant 0 : index
    %c0_22 = arith.constant 0 : index
    %37 = vector.load %arg9[%c0_21, %c0_22] : memref<1x64xf32, #tpu.memory_space<vmem>>, vector<1x64xf32>
    %38 = vector.broadcast %37 : vector<1x64xf32> to vector<16x64xf32>
    %39 = arith.addf %36, %38 : vector<16x64xf32>
    %cst_23 = arith.constant 0.000000e+00 : f32
    %40 = vector.broadcast %cst_23 : f32 to vector<16x64xf32>
    %41 = arith.cmpf oge, %39, %40 : vector<16x64xf32>
    %cst_24 = arith.constant 0.00999999977 : f32
    %42 = vector.broadcast %cst_24 : f32 to vector<16x64xf32>
    %43 = arith.mulf %42, %39 : vector<16x64xf32>
    %44 = arith.select %41, %39, %43 : vector<16x64xi1>, vector<16x64xf32>
    %cst_25 = arith.constant 0.000000e+00 : f32
    %45 = vector.broadcast %cst_25 : f32 to vector<1x64xf32>
    %cst_26 = arith.constant 0.000000e+00 : f32
    %46 = vector.broadcast %cst_26 : f32 to vector<7x64xf32>
    %47 = tpu.concatenate %45, %44, %46 in 0 : vector<1x64xf32>, vector<16x64xf32>, vector<7x64xf32> -> vector<24x64xf32>
    %48 = vector.extract_strided_slice %47 {offsets = [0, 0], sizes = [16, 64], strides = [1, 1]} : vector<24x64xf32> to vector<16x64xf32>
    %49 = vector.extract_strided_slice %47 {offsets = [1, 0], sizes = [16, 64], strides = [1, 1]} : vector<24x64xf32> to vector<16x64xf32>
    %50 = vector.extract_strided_slice %47 {offsets = [2, 0], sizes = [16, 64], strides = [1, 1]} : vector<24x64xf32> to vector<16x64xf32>
    %51 = tpu.concatenate %48, %49, %50 in 1 : vector<16x64xf32>, vector<16x64xf32>, vector<16x64xf32> -> vector<16x192xf32>
    %52 = arith.truncf %51 : vector<16x192xf32> to vector<16x192xbf16>
    %c0_27 = arith.constant 0 : index
    %c0_28 = arith.constant 0 : index
    %53 = vector.load %arg10[%c0_27, %c0_28] : memref<192x128xbf16, #tpu.memory_space<vmem>>, vector<192x128xbf16>
    %cst_29 = arith.constant dense<0.000000e+00> : vector<16x128xf32>
    %54 = tpu.matmul %52, %53, %cst_29 {dimension_numbers = #tpu.dot_dimension_numbers<[1], [0], [0], [1], [0, 0, 1, 1], [], []>} : vector<16x192xbf16>, vector<192x128xbf16>, vector<16x128xf32> -> vector<16x128xf32>
    %c0_30 = arith.constant 0 : index
    %c0_31 = arith.constant 0 : index
    %55 = vector.load %arg11[%c0_30, %c0_31] : memref<1x128xf32, #tpu.memory_space<vmem>>, vector<1x128xf32>
    %56 = vector.broadcast %55 : vector<1x128xf32> to vector<16x128xf32>
    %57 = arith.addf %54, %56 : vector<16x128xf32>
    %c0_32 = arith.constant 0 : index
    %c0_33 = arith.constant 0 : index
    %58 = vector.load %arg12[%c0_32, %c0_33] : memref<1x128xf32, #tpu.memory_space<vmem>>, vector<1x128xf32>
    %59 = vector.broadcast %58 : vector<1x128xf32> to vector<16x128xf32>
    %60 = arith.mulf %57, %59 : vector<16x128xf32>
    %c0_34 = arith.constant 0 : index
    %c0_35 = arith.constant 0 : index
    %61 = vector.load %arg13[%c0_34, %c0_35] : memref<1x128xf32, #tpu.memory_space<vmem>>, vector<1x128xf32>
    %62 = vector.broadcast %61 : vector<1x128xf32> to vector<16x128xf32>
    %63 = arith.addf %60, %62 : vector<16x128xf32>
    %cst_36 = arith.constant 0.000000e+00 : f32
    %64 = vector.broadcast %cst_36 : f32 to vector<16x128xf32>
    %65 = arith.cmpf oge, %63, %64 : vector<16x128xf32>
    %cst_37 = arith.constant 0.00999999977 : f32
    %66 = vector.broadcast %cst_37 : f32 to vector<16x128xf32>
    %67 = arith.mulf %66, %63 : vector<16x128xf32>
    %68 = arith.select %65, %63, %67 : vector<16x128xi1>, vector<16x128xf32>
    %c0_38 = arith.constant 0 : index
    %c0_39 = arith.constant 0 : index
    %c0_40 = arith.constant 0 : index
    %69 = vector.load %arg14[%c0_38, %c0_39, %c0_40] : memref<1x16x128xf32, #tpu.memory_space<vmem>>, vector<1x16x128xf32>
    %70 = vector.shape_cast %69 : vector<1x16x128xf32> to vector<16x128xf32>
    %71 = vector.shape_cast %68 : vector<16x128xf32> to vector<1x16x128xf32>
    tpu.vector_store %arg14[%c0_38, %c0_39, %c0_40], %71 {strides = array<i32>} : memref<1x16x128xf32, #tpu.memory_space<vmem>>, vector<1x16x128xf32>,
    return
  }
  func.func @transform_0(%arg0: i32) -> (i32, i32, i32) {
    %c0_i32 = arith.constant 0 : i32
    %c0_i32_0 = arith.constant 0 : i32
    %c0_i32_1 = arith.constant 0 : i32
    return %arg0, %c0_i32, %c0_i32_0 : i32, i32, i32
  }
  func.func @transform_1(%arg0: i32) -> (i32, i32) {
    %c0_i32 = arith.constant 0 : i32
    %c0_i32_0 = arith.constant 0 : i32
    %c0_i32_1 = arith.constant 0 : i32
    return %c0_i32, %c0_i32_0 : i32, i32
  }
  func.func @transform_2(%arg0: i32) -> (i32, i32) {
    %c0_i32 = arith.constant 0 : i32
    %c0_i32_0 = arith.constant 0 : i32
    %c0_i32_1 = arith.constant 0 : i32
    return %c0_i32, %c0_i32_0 : i32, i32
  }
  func.func @transform_3(%arg0: i32) -> (i32, i32) {
    %c0_i32 = arith.constant 0 : i32
    %c0_i32_0 = arith.constant 0 : i32
    %c0_i32_1 = arith.constant 0 : i32
    return %c0_i32, %c0_i32_0 : i32, i32
  }
  func.func @transform_4(%arg0: i32) -> (i32, i32) {
    %c0_i32 = arith.constant 0 : i32
    %c0_i32_0 = arith.constant 0 : i32
    %c0_i32_1 = arith.constant 0 : i32
    return %c0_i32, %c0_i32_0 : i32, i32
  }
  func.func @transform_5(%arg0: i32) -> (i32, i32) {
    %c0_i32 = arith.constant 0 : i32
    %c0_i32_0 = arith.constant 0 : i32
    %c0_i32_1 = arith.constant 0 : i32
    return %c0_i32, %c0_i32_0 : i32, i32
  }
  func.func @transform_6(%arg0: i32) -> (i32, i32) {
    %c0_i32 = arith.constant 0 : i32
    %c0_i32_0 = arith.constant 0 : i32
    %c0_i32_1 = arith.constant 0 : i32
    return %c0_i32, %c0_i32_0 : i32, i32
  }
  func.func @transform_7(%arg0: i32) -> (i32, i32) {
    %c0_i32 = arith.constant 0 : i32
    %c0_i32_0 = arith.constant 0 : i32
    %c0_i32_1 = arith.constant 0 : i32
    return %c0_i32, %c0_i32_0 : i32, i32
  }
  func.func @transform_8(%arg0: i32) -> (i32, i32) {
    %c0_i32 = arith.constant 0 : i32
    %c0_i32_0 = arith.constant 0 : i32
    %c0_i32_1 = arith.constant 0 : i32
    return %c0_i32, %c0_i32_0 : i32, i32
  }
  func.func @transform_9(%arg0: i32) -> (i32, i32) {
    %c0_i32 = arith.constant 0 : i32
    %c0_i32_0 = arith.constant 0 : i32
    %c0_i32_1 = arith.constant 0 : i32
    return %c0_i32, %c0_i32_0 : i32, i32
  }
  func.func @transform_10(%arg0: i32) -> (i32, i32) {
    %c0_i32 = arith.constant 0 : i32
    %c0_i32_0 = arith.constant 0 : i32
    %c0_i32_1 = arith.constant 0 : i32
    return %c0_i32, %c0_i32_0 : i32, i32
  }
  func.func @transform_11(%arg0: i32) -> (i32, i32) {
    %c0_i32 = arith.constant 0 : i32
    %c0_i32_0 = arith.constant 0 : i32
    %c0_i32_1 = arith.constant 0 : i32
    return %c0_i32, %c0_i32_0 : i32, i32
  }
  func.func @transform_12(%arg0: i32) -> (i32, i32) {
    %c0_i32 = arith.constant 0 : i32
    %c0_i32_0 = arith.constant 0 : i32
    %c0_i32_1 = arith.constant 0 : i32
    return %c0_i32, %c0_i32_0 : i32, i32
  }
  func.func @transform_13(%arg0: i32) -> (i32, i32, i32) {
    %c0_i32 = arith.constant 0 : i32
    %c0_i32_0 = arith.constant 0 : i32
    %c0_i32_1 = arith.constant 0 : i32
    return %arg0, %c0_i32, %c0_i32_0 : i32, i32, i32
  }
}

</mosaic_0001>

<bundles_post_ra>
// kernel: tpu_custom_call.1
= control target key start
LH: loop header
LB: loop body
LE: loop exit
PB: predicated region body
PF: predicated region fallthrough
CT: control target
= control target key end

     0   :  { %s1495_s0 = inlined_call_operand.vmem [shape: f32[2,16,8], index: 0, kind: input, shape index: {}]   ;;  %s1496_s1 = inlined_call_operand.vmem [shape: bf16[8,32], index: 1, kind: input, shape index: {}]   ;;  %s1497_s2 = inlined_call_operand.vmem [shape: f32[1,32], index: 2, kind: input, shape index: {}]   ;;  %s1498_s3 = inlined_call_operand.vmem [shape: f32[1,32], index: 3, kind: input, shape index: {}]   ;;  %s1499_s4 = inlined_call_operand.vmem [shape: f32[1,32], index: 4, kind: input, shape index: {}]   ;;  %s1500_s5 = inlined_call_operand.vmem [shape: bf16[160,64], index: 5, kind: input, shape index: {}]   ;;  %s1501_s6 = inlined_call_operand.vmem [shape: f32[1,64], index: 6, kind: input, shape index: {}]   ;;  %s1502_s7 = inlined_call_operand.vmem [shape: f32[1,64], index: 7, kind: input, shape index: {}]   ;;  %s1503_s8 = inlined_call_operand.vmem [shape: f32[1,64], index: 8, kind: input, shape index: {}]   ;;  %s1504_s9 = inlined_call_operand.vmem [shape: bf16[192,128], index: 9, kind: input, shape index: {}]   ;;  %s1505_s10 = inlined_call_operand.vmem [shape: f32[1,128], index: 10, kind: input, shape index: {}]   ;;  %s1506_s11 = inlined_call_operand.vmem [shape: f32[1,128], index: 11, kind: input, shape index: {}]   ;;  %s1507_s12 = inlined_call_operand.vmem [shape: f32[1,128], index: 12, kind: input, shape index: {}]   ;;  %s1508_s13 = inlined_call_operand.hbm [shape: f32[2,16,128], index: 13, kind: output, shape index: {}]  }
   0x1   :  { %1510 = sst [smem:[#allocation6_spill]] %s1495_s0 }
   0x2   :  { %1511 = sst [smem:[#allocation7_spill]] %s1496_s1 }
   0x3   :  { %18 = vsyncpa [#allocation3], 0 }
   0x4   :  { %20 = vsyncpa [#allocation3 + $0x1], 0  ;;  %s1291_s25 = smov 0   ;;  %s1293_s26 = smov 0  }
   0x5   :  { %s1295_s27 = smov 0   ;;  %s1297_s28 = smov 0  }
   0x6 LB: > { %s1312_s29 = sadd.s32 4294967295, %s1214_s28   ;;  %s952_s30 = sadd.s32 4294967294, %s1214_s28   ;;  %s1214_s28 = sphi %s1297_s28, %s1522_s28   ;;  %s1210_s27 = sphi %s1295_s27, %s1521_s27   ;;  %s1206_s26 = sphi %s1293_s26, %s1520_s26   ;;  %s1202_s25 = sphi %s1291_s25, %s1519_s25  }
   0x7   : > { %s1316_s14 = sadd.s32 1, %s1214_s28   ;;  %s311_s15 = sadd.s32 1, %s1210_s27 }
   0x8   : > { %s308_s16 = ssub.s32 %s1214_s28, %s1316_s14  ;;  %p321_p0 = scmp.ne.s32.totalorder %s1210_s27, %s1206_s26 }
   0x9   : > { %p309_p1 = scmp.eq.s32.totalorder %s308_s16, 0  ;;  %p322_p2 = scmp.eq.s32.totalorder %s1312_s29, 1 }
   0xa   : > { %p327_p3 = scmp.ne.s32.totalorder %s1206_s26, %s1202_s25  ;;  %p328_p4 = scmp.eq.s32.totalorder %s952_s30, 1 }
   0xb   : > { %s1327_s17 = scalar_select %p309_p1, %s1210_s27, %s311_s15  }
   0xc   : > { %p1329_p5 = por %p322_p2, %p321_p0  ;;  %p1333_p6 = por %p328_p4, %p327_p3 }
   0xd   : > { %1512 = sst [smem:[#allocation5_spill]] %s1327_s17  ;;  %p955_p7 = scmp.ge.s32.totalorder %s1214_s28, 1 }
   0xe   : > { %p390_p8 = scmp.lt.s32.totalorder %s1214_s28, 3 }
  0x10   : > { %p391_p9 = pnand %p955_p7, %p390_p8 }
  0x11   : > { %s1515_s1 = sld [smem:[#allocation7_spill]] (!%p391_p9)  ;;  %p434_p10 = scmp.lt.s32.totalorder (!%p391_p9), %s1312_s29, 1 }
  0x12   : > { %394 = sbr.rel (%p391_p9) target bundleno = 739 (0x2e3), region = 72  ;;  %s1516_s0 = sld [smem:[#allocation6_spill]] (!%p391_p9) }
  0x13   : > { %s1216_s16 = smov (!%p391_p9), 96   ;;  %s1217_s20 = smov (!%p391_p9), 32  }
  0x14   : > { %s1517_s24 = smov (!%p391_p9), 64   ;;  %s1078_s30 = sshll.u32 (!%p391_p9), %s1312_s29, 4 }
  0x17   : > { %v443_v0 = vld [vmem:[%s1515_s1] sm:$0xf]  ;;  %vm452_vm0 = vcmask 1043456   ;;  %s435_s22 = scalar_select %p434_p10, %s1312_s29, 1  ;;  %vm448_vm1 = vcmask 64512   ;;  %v1065_v5 = vld [vmem:[%s1500_s5 + $0x48] sm:$0xff] }
  0x18   : > { %v454_v1 = vsel %vm452_vm0, %v443_v0, 0  ;;  %662 = vmatpush.bf16.msra.mxu2 %v1065_v5  ;;  %v1064_v6 = vld [vmem:[%s1500_s5 + $0x40] sm:$0xff]  ;;  %v1063_v13 = vld [vmem:[%s1500_s5 + $0x38] sm:$0xff]  ;;  %v1062_v15 = vld [vmem:[%s1500_s5 + $0x30] sm:$0xff]  ;;  %vm490_vm3 = vcmask 1041408   ;;  %vm525_vm5 = vcmask 1044480  }
  0x19   : > { %463 = vmatpush.bf16.msra.mxu0 %v454_v1  ;;  %s1055_s23 = sshll.u32 %s435_s22, 4  ;;  %v1143_v7 = vld [vmem:[%s1497_s2] ss:$0 sm:$0xff]  ;;  %642 = vmatpush.bf16.msra.mxu1 %v1063_v13  ;;  %v1061_v19 = vld [vmem:[%s1500_s5 + $0x28] sm:$0xff]  ;;  %v1059_v28 = vld [vmem:[%s1500_s5 + $0x18] sm:$0xff]  ;;  %vm501_vm6 = vcmask 1046528  }
  0x1a   : > { %s438_s15 = scalar_lea.vmem %s1516_s0, %s1055_s23  ;;  %v1144_v8 = vld [vmem:[%s1498_s3] ss:$0 sm:$0xff]  ;;  %vm544_vm7 = vcmask 261120   ;;  %vm513_vm8 = vcmask 1045504   ;;  %s1509_s1 = smov 64   ;;  %v1058_v56 = vld [vmem:[%s1500_s5 + $0x10] sm:$0xff] }
  0x1b   : > { %v440_v2 = vld [vmem:[%s438_s15] sm:$0xff]  ;;  %v441_v3 = vld [vmem:[%s438_s15 + $0x8] sm:$0xff]  ;;  %vm547_vm9 = vcmask 523264   ;;  %vm550_vm10 = vcmask 785408   ;;  %vm690_vm12 = vcmask 1040384   ;;  %s1172_s15 = scalar_lea.hbm %s1508_s13, 32 }
  0x1c   : > { %v442_v4 = vpack.c.bf16 %v441_v3, %v440_v2  ;;  %663 = vmatpush.bf16.msra.mxu2 %v1064_v6  ;;  %v1145_v11 = vld [vmem:[%s1499_s4] ss:$0 sm:$0xff]  ;;  %v1057_v57 = vld [vmem:[%s1500_s5 + $0x8] sm:$0xff] }
  0x1d   : > { %643 = vmatpush.bf16.msra.mxu1 %v1062_v15  ;;  %v1060_v24 = vld [vmem:[%s1500_s5 + $0x20] sm:$0xff]  ;;  %v1075_v13 = vld [vmem:[%s1504_s9 + $0x48] sm:$0xff]  ;;  %v1073_v15 = vld [vmem:[%s1504_s9 + $0x38] sm:$0xff] }
  0x1e   : > { %959 = vmatmul.msk.bf16.vlgmr.msra.gmra.mxu0 %vm448_vm1, %v442_v4  ;;  %v1056_v58 = vld [vmem:[%s1500_s5] sm:$0xff]  ;;  %826 = vmatpush.bf16.msra.mxu3 %v1073_v15 }
  0x21   : > { %644 = vmatpush.bf16.msra.mxu1 %v1061_v19 }
  0x25   : > { %645 = vmatpush.bf16.msra.mxu1 %v1060_v24  ;;  %v1148_v24 = vld [vmem:[%s1503_s8] ss:$0 sm:$0xff] }
  0x29   : > { %646 = vmatpush.bf16.msra.mxu1 %v1059_v28 }
  0x2d   : > { %647 = vmatpush.bf16.msra.mxu1 %v1058_v56 }
  0x31   : > { %648 = vmatpush.bf16.msra.mxu1 %v1057_v57 }
  0x35   : > { %649 = vmatpush.bf16.msra.mxu1 %v1056_v58  ;;  %v1066_v58 = vld [vmem:[%s1504_s9] sm:$0xff] }
  0x9b   : > { %v465_v9 = vpop.f32.mrf.mxu0 }
  0x9c   : > { %v466_v10 = vadd.f32 %v1143_v7, %v465_v9 }
  0x9e   : > { %v474_v12 = vmul.f32 %v1144_v8, %v466_v10 }
  0xa0   : > { %v480_v14 = vadd.f32 %v1145_v11, %v474_v12  ;;  %v1076_v12 = vld [vmem:[%s1504_s9 + $0x50] sm:$0xff] }
  0xa2   : > { %vm482_vm2 = vcmp.ge.f32.partialorder %v480_v14, 0.0  ;;  %v484_v16 = vmul.f32 0.01, %v480_v14 }
  0xa3   : > { %v467_v17 = vpop.f32.mrf.mxu0 }
  0xa4   : > { %v468_v18 = vadd.f32 %v1143_v7, %v467_v17  ;;  %v486_v20 = vsel %vm482_vm2, %v480_v14, %v484_v16  ;;  %v1074_v14 = vld [vmem:[%s1504_s9 + $0x40] sm:$0xff]  ;;  %v1072_v17 = vld [vmem:[%s1504_s9 + $0x30] sm:$0xff] }
  0xa5   : > { %v491_v22 = vrot.slane %v486_v20, 6  ;;  %v1146_v16 = vld [vmem:[%s1501_s6] ss:$0 sm:$0xff]  ;;  %827 = vmatpush.bf16.msra.mxu3 %v1072_v17 }
  0xa6   : > { %v475_v21 = vmul.f32 %v1144_v8, %v468_v18 }
  0xa7   : > { %v497_v26 = vsel %vm490_vm3, 0.0, %v491_v22 }
  0xa8   : > { %v481_v23 = vadd.f32 %v1145_v11, %v475_v21  ;;  %v537_v32 = vrot.slane %v497_v26, 4  ;;  %v526_v33 = vrot.slane %v497_v26, 3  ;;  %v502_v38 = vrot.slane %v497_v26, 1  ;;  %v1077_v11 = vld [vmem:[%s1504_s9 + $0x58] sm:$0xff]  ;;  %v1147_v21 = vld [vmem:[%s1502_s7] ss:$0 sm:$0xff] }
  0xa9   : > { %v514_v52 = vrot.slane %v497_v26, 2  ;;  %844 = vmatpush.bf16.msrb.mxu0 %v1077_v11 }
  0xaa   : > { %vm483_vm4 = vcmp.ge.f32.partialorder %v481_v23, 0.0  ;;  %v485_v25 = vmul.f32 0.01, %v481_v23 }
  0xac   : > { %v487_v27 = vsel %vm483_vm4, %v481_v23, %v485_v25 }
  0xad   : > { %v492_v29 = vrot.slane %v487_v27, 6  ;;  %845 = vmatpush.bf16.msrb.mxu0 %v1076_v12 }
  0xaf   : > { %v493_v30 = vsel %vm490_vm3, %v491_v22, %v492_v29  ;;  %v498_v31 = vsel %vm490_vm3, %v492_v29, 0.0  ;;  %v1071_v22 = vld [vmem:[%s1504_s9 + $0x28] sm:$0xff] }
  0xb0   : > { %v538_v34 = vrot.slane %v493_v30, 4  ;;  %v540_v35 = vrot.slane %v498_v31, 4  ;;  %v527_v36 = vrot.slane %v493_v30, 3  ;;  %v529_v37 = vrot.slane %v498_v31, 3  ;;  %828 = vmatpush.bf16.msra.mxu3 %v1071_v22 }
  0xb1   : > { %v503_v39 = vrot.slane %v493_v30, 1  ;;  %v505_v40 = vrot.slane %v498_v31, 1  ;;  %v515_v50 = vrot.slane %v493_v30, 2  ;;  %v517_v51 = vrot.slane %v498_v31, 2  ;;  %846 = vmatpush.bf16.msrb.mxu0 %v1075_v13 }
  0xb2   : > { %v539_v41 = vsel %vm452_vm0, %v537_v32, %v538_v34  ;;  %v541_v42 = vsel %vm452_vm0, %v538_v34, %v540_v35  ;;  %v528_v43 = vsel %vm525_vm5, %v526_v33, %v527_v36  ;;  %v530_v44 = vsel %vm525_vm5, %v527_v36, %v529_v37  ;;  %v1069_v32 = vld [vmem:[%s1504_s9 + $0x18] sm:$0xff]  ;;  %v1068_v36 = vld [vmem:[%s1504_s9 + $0x10] sm:$0xff] }
  0xb3   : > { %v554_v45 = vpack.c.bf16 %v541_v42, %v539_v41  ;;  %v1133_v46 = vpack.i.bf16 %v530_v44, %v528_v43  ;;  %v504_v47 = vsel %vm501_vm6, %v502_v38, %v503_v39  ;;  %v506_v48 = vsel %vm501_vm6, %v503_v39, %v505_v40  ;;  %v1067_v40 = vld [vmem:[%s1504_s9 + $0x8] sm:$0xff] }
  0xb4   : > { %v1123_v49 = vpack.i.bf16 %v506_v48, %v504_v47  ;;  %v516_v53 = vsel %vm513_vm8, %v514_v52, %v515_v50  ;;  %v518_v54 = vsel %vm513_vm8, %v515_v50, %v517_v51 }
  0xb5   : > { %1000 = vmatmul.msk.bf16.vlgmr.msra.gmra.mxu2 %vm544_vm7, %v554_v45  ;;  %1134 = vrot.lane.b32.xlu1 %v1133_v46, %s1216_s16  ;;  %v1128_v55 = vpack.i.bf16 %v518_v54, %v516_v53 }
  0xb6   : > { %1124 = vrot.lane.b32.xlu0 %v1123_v49, %s1217_s20  ;;  %847 = vmatpush.bf16.msrb.mxu0 %v1074_v14  ;;  %s886_s20 = scalar_lea.hbm %s1508_s13, %s1078_s30 }
  0xb7   : > { %s889_s22 = sshll.u32 %s886_s20, 4  ;;  %s890_s22 = int_to_ptr.hbm [resolvable:$true] %s889_s22 }
  0xb8   : > { %s1166_s23 = sshra.s32 %s890_s22, 4  ;;  %s1167_s23 = int_to_ptr.hbm [resolvable:$true] %s1166_s23 }
  0xb9   : > { %s1168_s0 = scalar_lea.hbm %s1167_s23, 16  ;;  %p1173_p0 = scmp.lt.s32.totalorder %s1167_s23, %s1508_s13 }
  0xba   : > { %p1169_p11 = scmp.ne.s32.totalorder %s1167_s23, %s1168_s0  ;;  %p1174_p1 = scmp.lt.s32.totalorder %s1172_s15, %s1168_s0 }
  0xbc   : > { %p1170_p12 = pnand %p1169_p11, %p1329_p5  ;;  %p1175_p2 = por %p1174_p1, %p1173_p0 }
  0xbe   : > { %1129 = vrot.lane.b32.xlu0 %v1128_v55, %s1509_s1  ;;  %s431_s1 = sand.u32 1, %s1206_s26   ;;  %p1171_p13 = pneg %p1170_p12 }
  0xbf   : > { %s875_s29 = scalar_lea.sflag [#allocation3], %s431_s1 }
  0xc0   : > { %p1176_p3 = pnand %p1175_p2, %p1171_p13 }
 0x127   : > { %v1135_v62 = vpop.permute.xlu1 %1134 }
 0x128   : > { %v1125_v59 = vpop.permute.xlu0 %1124  ;;  %v1137_v2 = vunpack.i.h.bf16 %v1135_v62  ;;  %v1136_v3 = vunpack.i.l.bf16 %v1135_v62 }
 0x129   : > { %v1127_v60 = vunpack.i.h.bf16 %v1125_v59  ;;  %v1126_v61 = vunpack.i.l.bf16 %v1125_v59 }
 0x12b   : > { %v546_v4 = vsel %vm544_vm7, %v493_v30, %v1127_v60  ;;  %v545_v5 = vsel %vm544_vm7, %v497_v26, %v1126_v61  ;;  %v1070_v26 = vld [vmem:[%s1504_s9 + $0x20] sm:$0xff] }
 0x12c   : > { %829 = vmatpush.bf16.msra.mxu3 %v1070_v26 }
 0x130   : > { %v1130_v63 = vpop.permute.xlu0 %1129  ;;  %830 = vmatpush.bf16.msra.mxu3 %v1069_v32 }
 0x131   : > { %v1132_v0 = vunpack.i.h.bf16 %v1130_v63  ;;  %v1131_v1 = vunpack.i.l.bf16 %v1130_v63 }
 0x133   : > { %v548_v6 = vsel %vm547_vm9, %v545_v5, %v1131_v1  ;;  %v549_v7 = vsel %vm547_vm9, %v546_v4, %v1132_v0  ;;  %v1149_v1 = vld [vmem:[%s1505_s10] ss:$0 sm:$0xff] }
 0x134   : > { %v551_v8 = vsel %vm550_vm10, %v548_v6, %v1136_v3  ;;  %v552_v9 = vsel %vm550_vm10, %v549_v7, %v1137_v2  ;;  %831 = vmatpush.bf16.msra.mxu3 %v1068_v36  ;;  %v1150_v5 = vld [vmem:[%s1506_s11] ss:$0 sm:$0xff] }
 0x135   : > { %v553_v10 = vpack.c.bf16 %v552_v9, %v551_v8  ;;  %v1151_v7 = vld [vmem:[%s1507_s12] ss:$0 sm:$0xff] }
 0x137   : > { %650 = vmatmul.bf16.vlgmr.msra.gmra.mxu1 %v553_v10 }
 0x138   : > { %v665_v18 = vpop.f32.mrf.mxu2  ;;  %832 = vmatpush.bf16.msra.mxu3 %v1067_v40 }
 0x13c   : > { %833 = vmatpush.bf16.msra.mxu3 %v1066_v58 }
 0x140   : > { %v667_v31 = vpop.f32.mrf.mxu2 }
 0x1b4   : > { %v651_v19 = vpop.f32.mrf.mxu1 }
 0x1b5   : > { %v652_v20 = vadd.f32 %v1146_v16, %v651_v19 }
 0x1b7   : > { %v666_v23 = vadd.f32 %v665_v18, %v652_v20 }
 0x1b9   : > { %v674_v25 = vmul.f32 %v1147_v21, %v666_v23 }
 0x1bb   : > { %v680_v27 = vadd.f32 %v1148_v24, %v674_v25 }
 0x1bc   : > { %v653_v28 = vpop.f32.mrf.mxu1 }
 0x1bd   : > { %vm682_vm11 = vcmp.ge.f32.partialorder %v680_v27, 0.0  ;;  %v684_v29 = vmul.f32 0.01, %v680_v27  ;;  %v654_v30 = vadd.f32 %v1146_v16, %v653_v28 }
 0x1bf   : > { %v668_v33 = vadd.f32 %v667_v31, %v654_v30  ;;  %v686_v34 = vsel %vm682_vm11, %v680_v27, %v684_v29 }
 0x1c0   : > { %v691_v37 = vrot.slane %v686_v34, 7 }
 0x1c1   : > { %v675_v35 = vmul.f32 %v1147_v21, %v668_v33 }
 0x1c2   : > { %v697_v41 = vsel %vm690_vm12, 0.0, %v691_v37 }
 0x1c3   : > { %v681_v38 = vadd.f32 %v1148_v24, %v675_v35  ;;  %v712_v46 = vrot.slane %v697_v41, 2  ;;  %v701_v47 = vrot.slane %v697_v41, 1 }
 0x1c5   : > { %vm683_vm13 = vcmp.ge.f32.partialorder %v681_v38, 0.0  ;;  %v685_v39 = vmul.f32 0.01, %v681_v38 }
 0x1c7   : > { %v687_v42 = vsel %vm683_vm13, %v681_v38, %v685_v39 }
 0x1c8   : > { %v692_v43 = vrot.slane %v687_v42, 7 }
 0x1ca   : > { %v698_v44 = vsel %vm690_vm12, %v692_v43, 0.0  ;;  %v693_v45 = vsel %vm690_vm12, %v691_v37, %v692_v43 }
 0x1cb   : > { %v713_v48 = vrot.slane %v693_v45, 2  ;;  %v715_v49 = vrot.slane %v698_v44, 2  ;;  %v702_v50 = vrot.slane %v693_v45, 1  ;;  %v704_v51 = vrot.slane %v698_v44, 1 }
 0x1cd   : > { %v714_v52 = vsel %vm513_vm8, %v712_v46, %v713_v48  ;;  %v716_v53 = vsel %vm513_vm8, %v713_v48, %v715_v49  ;;  %v703_v54 = vsel %vm501_vm6, %v701_v47, %v702_v50  ;;  %v705_v55 = vsel %vm501_vm6, %v702_v50, %v704_v51 }
 0x1ce   : > { %v722_v56 = vpack.c.bf16 %v716_v53, %v714_v52  ;;  %v1138_v57 = vpack.i.bf16 %v705_v55, %v703_v54 }
 0x1d0   : > { %1049 = vmatmul.msk.bf16.vlgmr.msrb.gmra.mxu0 %vm547_vm9, %v722_v56  ;;  %1139 = vrot.lane.b32.xlu1 %v1138_v57, %s1517_s24  ;;  %s956_s24 = sshll.u32 %s431_s1, 4 }
 0x1d1   : > { %s433_s17 = scalar_lea.vmem [#allocation2], %s956_s24 }
 0x1d2   : > { %s887_s21 = sshll.u32 %s433_s17, 4  ;;  %s888_s21 = int_to_ptr.vmem [resolvable:$true] %s887_s21 }
 0x242   : > { %v1140_v59 = vpop.permute.xlu1 %1139 }
 0x243   : > { %v1142_v60 = vunpack.i.h.bf16 %v1140_v59  ;;  %v1141_v61 = vunpack.i.l.bf16 %v1140_v59 }
 0x245   : > { %v719_v62 = vsel %vm547_vm9, %v697_v41, %v1141_v61  ;;  %v720_v63 = vsel %vm547_vm9, %v693_v45, %v1142_v60 }
 0x246   : > { %v721_v0 = vpack.c.bf16 %v720_v63, %v719_v62 }
 0x248   : > { %834 = vmatmul.bf16.vlgmr.msra.gmra.mxu3 %v721_v0 }
 0x24d   : > { %v849_v2 = vpop.f32.mrf.mxu0 }
 0x255   : > { %v851_v13 = vpop.f32.mrf.mxu0 }
 0x2cb   : > { %v835_v3 = vpop.f32.mrf.mxu3 }
 0x2cc   : > { %v836_v4 = vadd.f32 %v1149_v1, %v835_v3 }
 0x2ce   : > { %v850_v6 = vadd.f32 %v849_v2, %v836_v4 }
 0x2d0   : > { %v858_v8 = vmul.f32 %v1150_v5, %v850_v6 }
 0x2d2   : > { %v864_v9 = vadd.f32 %v1151_v7, %v858_v8 }
 0x2d3   : > { %v837_v10 = vpop.f32.mrf.mxu3 }
 0x2d4   : > { %vm866_vm14 = vcmp.ge.f32.partialorder %v864_v9, 0.0  ;;  %v868_v11 = vmul.f32 0.01, %v864_v9  ;;  %v838_v12 = vadd.f32 %v1149_v1, %v837_v10 }
 0x2d6   : > { %v870_v14 = vsel %vm866_vm14, %v864_v9, %v868_v11  ;;  %v852_v15 = vadd.f32 %v851_v13, %v838_v12 }
 0x2d7   : > { %872 = vst [vmem:[%s433_s17] sm:$0xff] %v870_v14 }
 0x2d8   : > { %v859_v16 = vmul.f32 %v1150_v5, %v852_v15 }
 0x2da   : > { %v865_v17 = vadd.f32 %v1151_v7, %v859_v16 }
 0x2dc   : > { %vm867_vm15 = vcmp.ge.f32.partialorder %v865_v17, 0.0  ;;  %v869_v18 = vmul.f32 0.01, %v865_v17 }
 0x2de   : > { %v871_v19 = vsel %vm867_vm15, %v865_v17, %v869_v18 }
 0x2df   : > { %873 = vst [vmem:[%s433_s17 + $0x8] sm:$0xff] %v871_v19 }
 0x2e0   : > { %1179 = shalt.err (!%p1176_p3)
}
 0x2e1   : > { %s1219_s1 = smov 128   ;;  %s1220_s17 = smov 8  }
 0x2e2   : > { %1079 = dma.vmem_to_hbm [thread:$0]  (%p1329_p5), %s888_s21, 256, %s890_s22, %s875_s29, %s1219_s1, %s1219_s1, %s1220_s17  }
 0x2e3 PF: > { %p1085_p4 = scmp.ge.s32.totalorder %s1214_s28, 2  ;;  %s904_s24 = sand.u32 1, %s1202_s25  }
 0x2e4   : > { %s905_s30 = scalar_lea.sflag [#allocation3], %s904_s24 }
 0x2e5   : > { %p1082_p7 = pnand %p1085_p4, %p1333_p6 }
 0x2e7   : > { %p1083_p8 = pneg %p1082_p7 }
 0x2e9   : > { %1197 = dma.done.wait (%p1083_p8), %s905_s30, 256  }
 0x2ea   : > { %1199 = vsyncadd (%p1083_p8), %s905_s30, 4294967040  ;;  %s1518_s0 = sld [smem:[#allocation5_spill]]  ;;  %p23_p9 = scmp.ge.s32.totalorder %s1316_s14, 4  }
 0x2eb   : > { %s1519_s25 = smov %s1206_s26  ;;  %s1520_s26 = smov %s1210_s27 }
 0x2ec   : > { %s1522_s28 = smov %s1316_s14  ;;  %25 = sbr.rel (!%p23_p9) target bundleno = 6 (0x6), region = 107 }
 0x2f0   : > { %s1521_s27 = smov %s1518_s0 }
 0x2f1   :  { %911 = vsyncpa [#allocation3], 1 }
 0x2f2   :  { %913 = vsyncpa [#allocation3 + $0x1], 1 }

</bundles_post_ra>
